<compile_context>
chip_gen: v6e
topology: v6e:2x2x1
jax: 0.10.0
libtpu: 0.0.40
codegen_flags: <defaults>
</compile_context>

<pallas_src>
import jax
import jax.numpy as jnp
from jax.experimental import pallas as pl
from jax.experimental.pallas import tpu as pltpu


def _leaky_relu(v, slope=0.01):
    return jnp.where(v > 0, v, slope * v)


def mlp_kernel(x_ref, w1_ref, wmid_ref, w5_ref, b_ref, o_ref):
    """Feature-major MLP body.

    x_ref   : (tb, d_in) f32   input tile, native batch-major layout
    w1_ref  : (H, d_in)  bf16  fc1 weight (PyTorch out x in layout)
    wmid_ref: (3, H, H)  bf16  fc2..fc4 weights stacked
    w5_ref  : (H, 1)     f32   fc5 weight as a column (VPU path, not MXU)
    b_ref   : (H, 5)     f32   biases; column k = bias of layer k+1
                               (column 4 holds the fc5 scalar bias at row 0)
    o_ref   : (1, tb)    f32   output tile (batch on lanes -> lane-dense store)
    """
    b = b_ref[...]                                             # (H, 5) f32

    # Transpose the small input tile in-kernel: (tb, d_in) -> (d_in, tb).
    x_t = x_ref[...].T.astype(jnp.bfloat16)                    # batch on lanes

    # fc1: (H, d_in) @ (d_in, tb) -> (H, tb), f32 accumulation on the MXU.
    h = jnp.dot(w1_ref[...], x_t, preferred_element_type=jnp.float32)
    h = _leaky_relu(h + b[:, 0:1])

    # fc2..fc4: bf16 operands, f32 accumulation.
    for k in range(3):
        h = jnp.dot(wmid_ref[k], h.astype(jnp.bfloat16),
                    preferred_element_type=jnp.float32)        # (H, tb)
        h = _leaky_relu(h + b[:, k + 1:k + 2])

    # fc5 (M=1): VPU multiply + 16-sublane reduction instead of an MXU pass.
    o = jnp.sum(h * w5_ref[...], axis=0, keepdims=True)        # (1, tb)
    o_ref[...] = o + b[0:1, 4:5]


def _round_up(n, m):
    return ((n + m - 1) // m) * m


def _pick_tb(B):
    """Lane-dense batch tile: multiple of 128, capped for v7x VMEM, >=2 steps
    when the batch is big enough to benefit from megacore / pipelining."""
    bp = _round_up(B, 128)
    if bp <= 256:
        return 128
    tb = min(2048, (bp // 2 // 128) * 128)
    return max(128, tb)


def net_forward(x, packed, *, tb=None):
    """x: (B, p+q+1) float32.  packed = (w1, wmid, w5, b_all).  Returns (B, 1)."""
    x = jnp.asarray(x, jnp.float32)
    B, d_in = x.shape
    w1, wmid, w5, b_all = packed

    if tb is None:
        tb = _pick_tb(B)
    tb = max(128, _round_up(tb, 128))          # keep loads/stores lane-dense

    Bp = _round_up(B, tb)
    if Bp != B:
        x = jnp.pad(x, ((0, Bp - B), (0, 0)))  # zero rows, sliced off below

    def const_spec(arr):
        return pl.BlockSpec(arr.shape, lambda i, nd=arr.ndim: (0,) * nd)

    out = pl.pallas_call(
        mlp_kernel,
        out_shape=jax.ShapeDtypeStruct((1, Bp), jnp.float32),
        grid_spec=pltpu.PrefetchScalarGridSpec(
            num_scalar_prefetch=0,
            grid=(Bp // tb,),
            in_specs=[
                pl.BlockSpec((tb, d_in), lambda i: (i, 0)),    # x, native layout
                const_spec(w1),
                const_spec(wmid),
                const_spec(w5),
                const_spec(b_all),
            ],
            out_specs=pl.BlockSpec((1, tb), lambda i: (0, i)),  # lane-dense store
        ),
        compiler_params=pltpu.CompilerParams(
            dimension_semantics=("parallel",)),
    )(x, w1, wmid, w5, b_all)

    return out[:, :B].T                        # (B, 1); size-1-dim transpose


def init_params(key, p, q, n_unit=(16, 16, 16, 16)):
    """PyTorch nn.Linear-style init; weights stored (out_features, in_features)."""
    dims = [p + q + 1, *n_unit, 1]
    params = []
    for i in range(5):
        fan_in, fan_out = dims[i], dims[i + 1]
        key, kw, kb = jax.random.split(key, 3)
        bound = 1.0 / (fan_in ** 0.5)
        w = jax.random.uniform(kw, (fan_out, fan_in), jnp.float32, -bound, bound)
        b = jax.random.uniform(kb, (fan_out,), jnp.float32, -bound, bound)
        params.append((w, b))
    return params


def pack_params(params):
    """Consolidate the 10 parameter arrays into 4 kernel operands.

    fc1..fc4 weights go to bf16 (MXU-native); fc5 weight stays f32 as a column
    (it is applied on the VPU); all biases stay f32 in one (H, 5) array.
    """
    (w1, b1), (w2, b2), (w3, b3), (w4, b4), (w5, b5) = params
    hidden = b1.shape[0]
    w1_bf = w1.astype(jnp.bfloat16)                            # (H, d_in)
    wmid_bf = jnp.stack([w2, w3, w4], axis=0).astype(jnp.bfloat16)   # (3, H, H)
    w5_col = w5.reshape(hidden, 1).astype(jnp.float32)         # (H, 1)
    b_all = jnp.zeros((hidden, 5), jnp.float32)
    b_all = b_all.at[:, 0].set(b1).at[:, 1].set(b2)
    b_all = b_all.at[:, 2].set(b3).at[:, 3].set(b4)
    b_all = b_all.at[0, 4].set(b5[0])
    return w1_bf, wmid_bf, w5_col, b_all


def net_reference(x, params):
    """Pure f32 reference matching the PyTorch module."""
    h = x
    for i, (w, b) in enumerate(params):
        h = h @ w.T + b
        if i < 4:
            h = _leaky_relu(h)
    return h


if __name__ == "__main__":
    p, q = 5, 2                     # input dim = p + q + 1 = 8
    d_in = p + q + 1
    B = 300                         # non-multiple of 128: exercises padding + 3-step grid
    key = jax.random.PRNGKey(0)
    kx, kp = jax.random.split(key)
    x = jax.random.normal(kx, (B, d_in), jnp.float32)
    params = init_params(kp, p, q)
    packed = pack_params(params)

    out = net_forward(x, packed)
    out = jax.block_until_ready(out)

    ref = net_reference(x, params)
    assert out.shape == (B, 1)
    max_err = float(jnp.max(jnp.abs(out - ref)))
    # bf16 matmul operands (f32 accumulation) -> relaxed tolerance vs f32 ref.
    assert jnp.allclose(out, ref, atol=2e-2, rtol=2e-2), f"max abs err {max_err}"
    print("KERNEL_OK")
</pallas_src>

<mosaic_0001>
module attributes {stable_mosaic.version = 11 : i64} {
  func.func @mlp_kernel(%arg0: i32, %arg1: memref<128x8xf32, #tpu.memory_space<vmem>>, %arg2: memref<16x8xbf16, #tpu.memory_space<vmem>>, %arg3: memref<3x16x16xbf16, #tpu.memory_space<vmem>>, %arg4: memref<16x1xf32, #tpu.memory_space<vmem>>, %arg5: memref<16x5xf32, #tpu.memory_space<vmem>>, %arg6: memref<1x128xf32, #tpu.memory_space<vmem>>) attributes {dimension_semantics = [#tpu.dimension_semantics<parallel>], iteration_bounds = array<i64: 3>, scalar_prefetch = 0 : i64, scratch_operands = 0 : i64, tpu.core_type = #tpu.core_type<tc>, window_params = [{transform_indices = @transform_0, window_bounds = array<i64: 128, 8>}, {pipeline_mode = #tpu.pipeline_mode<synchronous>, transform_indices = @transform_1, window_bounds = array<i64: 16, 8>}, {pipeline_mode = #tpu.pipeline_mode<synchronous>, transform_indices = @transform_2, window_bounds = array<i64: 3, 16, 16>}, {pipeline_mode = #tpu.pipeline_mode<synchronous>, transform_indices = @transform_3, window_bounds = array<i64: 16, 1>}, {pipeline_mode = #tpu.pipeline_mode<synchronous>, transform_indices = @transform_4, window_bounds = array<i64: 16, 5>}, {transform_indices = @transform_5, window_bounds = array<i64: 1, 128>}]} {
    %c0 = arith.constant 0 : index
    %c0_0 = arith.constant 0 : index
    %0 = vector.load %arg5[%c0, %c0_0] : memref<16x5xf32, #tpu.memory_space<vmem>>, vector<16x5xf32>
    %c0_1 = arith.constant 0 : index
    %c0_2 = arith.constant 0 : index
    %1 = vector.load %arg1[%c0_1, %c0_2] : memref<128x8xf32, #tpu.memory_space<vmem>>, vector<128x8xf32>
    %2 = tpu.transpose %1, [1, 0] : vector<128x8xf32> -> vector<8x128xf32>
    %3 = arith.truncf %2 : vector<8x128xf32> to vector<8x128xbf16>
    %c0_3 = arith.constant 0 : index
    %c0_4 = arith.constant 0 : index
    %4 = vector.load %arg2[%c0_3, %c0_4] : memref<16x8xbf16, #tpu.memory_space<vmem>>, vector<16x8xbf16>
    %cst = arith.constant dense<0.000000e+00> : vector<16x128xf32>
    %5 = tpu.matmul %4, %3, %cst {dimension_numbers = #tpu.dot_dimension_numbers<[1], [0], [0], [1], [0, 0, 1, 1], [], []>} : vector<16x8xbf16>, vector<8x128xbf16>, vector<16x128xf32> -> vector<16x128xf32>
    %6 = vector.extract_strided_slice %0 {offsets = [0, 0], sizes = [16, 1], strides = [1, 1]} : vector<16x5xf32> to vector<16x1xf32>
    %7 = vector.broadcast %6 : vector<16x1xf32> to vector<16x128xf32>
    %8 = arith.addf %5, %7 : vector<16x128xf32>
    %cst_5 = arith.constant 0.000000e+00 : f32
    %9 = vector.broadcast %cst_5 : f32 to vector<16x128xf32>
    %10 = arith.cmpf ogt, %8, %9 : vector<16x128xf32>
    %cst_6 = arith.constant 0.00999999977 : f32
    %11 = vector.broadcast %cst_6 : f32 to vector<16x128xf32>
    %12 = arith.mulf %11, %8 : vector<16x128xf32>
    %13 = arith.select %10, %8, %12 : vector<16x128xi1>, vector<16x128xf32>
    %c0_7 = arith.constant 0 : index
    %c0_8 = arith.constant 0 : index
    %c0_9 = arith.constant 0 : index
    %14 = vector.load %arg3[%c0_7, %c0_8, %c0_9] : memref<3x16x16xbf16, #tpu.memory_space<vmem>>, vector<1x16x16xbf16>
    %15 = vector.shape_cast %14 : vector<1x16x16xbf16> to vector<16x16xbf16>
    %16 = arith.truncf %13 : vector<16x128xf32> to vector<16x128xbf16>
    %cst_10 = arith.constant dense<0.000000e+00> : vector<16x128xf32>
    %17 = tpu.matmul %15, %16, %cst_10 {dimension_numbers = #tpu.dot_dimension_numbers<[1], [0], [0], [1], [0, 0, 1, 1], [], []>} : vector<16x16xbf16>, vector<16x128xbf16>, vector<16x128xf32> -> vector<16x128xf32>
    %18 = vector.extract_strided_slice %0 {offsets = [0, 1], sizes = [16, 1], strides = [1, 1]} : vector<16x5xf32> to vector<16x1xf32>
    %19 = vector.broadcast %18 : vector<16x1xf32> to vector<16x128xf32>
    %20 = arith.addf %17, %19 : vector<16x128xf32>
    %cst_11 = arith.constant 0.000000e+00 : f32
    %21 = vector.broadcast %cst_11 : f32 to vector<16x128xf32>
    %22 = arith.cmpf ogt, %20, %21 : vector<16x128xf32>
    %cst_12 = arith.constant 0.00999999977 : f32
    %23 = vector.broadcast %cst_12 : f32 to vector<16x128xf32>
    %24 = arith.mulf %23, %20 : vector<16x128xf32>
    %25 = arith.select %22, %20, %24 : vector<16x128xi1>, vector<16x128xf32>
    %c1 = arith.constant 1 : index
    %c0_13 = arith.constant 0 : index
    %c0_14 = arith.constant 0 : index
    %26 = vector.load %arg3[%c1, %c0_13, %c0_14] : memref<3x16x16xbf16, #tpu.memory_space<vmem>>, vector<1x16x16xbf16>
    %27 = vector.shape_cast %26 : vector<1x16x16xbf16> to vector<16x16xbf16>
    %28 = arith.truncf %25 : vector<16x128xf32> to vector<16x128xbf16>
    %cst_15 = arith.constant dense<0.000000e+00> : vector<16x128xf32>
    %29 = tpu.matmul %27, %28, %cst_15 {dimension_numbers = #tpu.dot_dimension_numbers<[1], [0], [0], [1], [0, 0, 1, 1], [], []>} : vector<16x16xbf16>, vector<16x128xbf16>, vector<16x128xf32> -> vector<16x128xf32>
    %30 = vector.extract_strided_slice %0 {offsets = [0, 2], sizes = [16, 1], strides = [1, 1]} : vector<16x5xf32> to vector<16x1xf32>
    %31 = vector.broadcast %30 : vector<16x1xf32> to vector<16x128xf32>
    %32 = arith.addf %29, %31 : vector<16x128xf32>
    %cst_16 = arith.constant 0.000000e+00 : f32
    %33 = vector.broadcast %cst_16 : f32 to vector<16x128xf32>
    %34 = arith.cmpf ogt, %32, %33 : vector<16x128xf32>
    %cst_17 = arith.constant 0.00999999977 : f32
    %35 = vector.broadcast %cst_17 : f32 to vector<16x128xf32>
    %36 = arith.mulf %35, %32 : vector<16x128xf32>
    %37 = arith.select %34, %32, %36 : vector<16x128xi1>, vector<16x128xf32>
    %c2 = arith.constant 2 : index
    %c0_18 = arith.constant 0 : index
    %c0_19 = arith.constant 0 : index
    %38 = vector.load %arg3[%c2, %c0_18, %c0_19] : memref<3x16x16xbf16, #tpu.memory_space<vmem>>, vector<1x16x16xbf16>
    %39 = vector.shape_cast %38 : vector<1x16x16xbf16> to vector<16x16xbf16>
    %40 = arith.truncf %37 : vector<16x128xf32> to vector<16x128xbf16>
    %cst_20 = arith.constant dense<0.000000e+00> : vector<16x128xf32>
    %41 = tpu.matmul %39, %40, %cst_20 {dimension_numbers = #tpu.dot_dimension_numbers<[1], [0], [0], [1], [0, 0, 1, 1], [], []>} : vector<16x16xbf16>, vector<16x128xbf16>, vector<16x128xf32> -> vector<16x128xf32>
    %42 = vector.extract_strided_slice %0 {offsets = [0, 3], sizes = [16, 1], strides = [1, 1]} : vector<16x5xf32> to vector<16x1xf32>
    %43 = vector.broadcast %42 : vector<16x1xf32> to vector<16x128xf32>
    %44 = arith.addf %41, %43 : vector<16x128xf32>
    %cst_21 = arith.constant 0.000000e+00 : f32
    %45 = vector.broadcast %cst_21 : f32 to vector<16x128xf32>
    %46 = arith.cmpf ogt, %44, %45 : vector<16x128xf32>
    %cst_22 = arith.constant 0.00999999977 : f32
    %47 = vector.broadcast %cst_22 : f32 to vector<16x128xf32>
    %48 = arith.mulf %47, %44 : vector<16x128xf32>
    %49 = arith.select %46, %44, %48 : vector<16x128xi1>, vector<16x128xf32>
    %c0_23 = arith.constant 0 : index
    %c0_24 = arith.constant 0 : index
    %50 = vector.load %arg4[%c0_23, %c0_24] : memref<16x1xf32, #tpu.memory_space<vmem>>, vector<16x1xf32>
    %51 = vector.broadcast %50 : vector<16x1xf32> to vector<16x128xf32>
    %52 = arith.mulf %49, %51 : vector<16x128xf32>
    %cst_25 = arith.constant dense<0.000000e+00> : vector<128xf32>
    %53 = vector.multi_reduction <add>, %52, %cst_25 [0] : vector<16x128xf32> to vector<128xf32>
    %54 = vector.shape_cast %53 : vector<128xf32> to vector<1x128xf32>
    %55 = vector.extract_strided_slice %0 {offsets = [0, 4], sizes = [1, 1], strides = [1, 1]} : vector<16x5xf32> to vector<1x1xf32>
    %56 = vector.broadcast %55 : vector<1x1xf32> to vector<1x128xf32>
    %57 = arith.addf %54, %56 : vector<1x128xf32>
    %c0_26 = arith.constant 0 : index
    %c0_27 = arith.constant 0 : index
    %58 = vector.load %arg6[%c0_26, %c0_27] : memref<1x128xf32, #tpu.memory_space<vmem>>, vector<1x128xf32>
    tpu.vector_store %arg6[%c0_26, %c0_27], %57 {strides = array<i32>} : memref<1x128xf32, #tpu.memory_space<vmem>>, vector<1x128xf32>,
    return
  }
  func.func @transform_0(%arg0: i32) -> (i32, i32) {
    %c0_i32 = arith.constant 0 : i32
    %c0_i32_0 = arith.constant 0 : i32
    return %arg0, %c0_i32 : i32, i32
  }
  func.func @transform_1(%arg0: i32) -> (i32, i32) {
    %c0_i32 = arith.constant 0 : i32
    %c0_i32_0 = arith.constant 0 : i32
    %c0_i32_1 = arith.constant 0 : i32
    return %c0_i32, %c0_i32_0 : i32, i32
  }
  func.func @transform_2(%arg0: i32) -> (i32, i32, i32) {
    %c0_i32 = arith.constant 0 : i32
    %c0_i32_0 = arith.constant 0 : i32
    %c0_i32_1 = arith.constant 0 : i32
    %c0_i32_2 = arith.constant 0 : i32
    return %c0_i32, %c0_i32_0, %c0_i32_1 : i32, i32, i32
  }
  func.func @transform_3(%arg0: i32) -> (i32, i32) {
    %c0_i32 = arith.constant 0 : i32
    %c0_i32_0 = arith.constant 0 : i32
    %c0_i32_1 = arith.constant 0 : i32
    return %c0_i32, %c0_i32_0 : i32, i32
  }
  func.func @transform_4(%arg0: i32) -> (i32, i32) {
    %c0_i32 = arith.constant 0 : i32
    %c0_i32_0 = arith.constant 0 : i32
    %c0_i32_1 = arith.constant 0 : i32
    return %c0_i32, %c0_i32_0 : i32, i32
  }
  func.func @transform_5(%arg0: i32) -> (i32, i32) {
    %c0_i32 = arith.constant 0 : i32
    %c0_i32_0 = arith.constant 0 : i32
    return %c0_i32, %arg0 : i32, i32
  }
}

</mosaic_0001>

<bundles_post_ra>
// kernel: tpu_custom_call.1
= control target key start
LH: loop header
LB: loop body
LE: loop exit
PB: predicated region body
PF: predicated region fallthrough
CT: control target
= control target key end

     0   :  { %10 = vsyncpa [#allocation3], 0  ;;  %s1012_s0 = inlined_call_operand.vmem [shape: f32[384,8], index: 0, kind: input, shape index: {}]   ;;  %s1013_s1 = inlined_call_operand.vmem [shape: bf16[16,8], index: 1, kind: input, shape index: {}]   ;;  %s1014_s2 = inlined_call_operand.vmem [shape: bf16[3,16,16], index: 2, kind: input, shape index: {}]   ;;  %s1015_s3 = inlined_call_operand.vmem [shape: f32[16,1], index: 3, kind: input, shape index: {}]   ;;  %s1016_s4 = inlined_call_operand.vmem [shape: f32[16,5], index: 4, kind: input, shape index: {}]   ;;  %s1017_s5 = inlined_call_operand.hbm [shape: f32[1,384], index: 5, kind: output, shape index: {}]  }
   0x1   :  { %12 = vsyncpa [#allocation3 + $0x1], 0  ;;  %s854_s18 = smov 0   ;;  %s856_s19 = smov 0  }
   0x2   :  { %s858_s20 = smov 0   ;;  %s860_s21 = smov 0  }
   0x3 LB: > { %s643_s22 = sadd.s32 4294967295, %s814_s21   ;;  %s644_s23 = sadd.s32 4294967294, %s814_s21   ;;  %s814_s21 = sphi %s860_s21, %s1023_s21   ;;  %s810_s20 = sphi %s858_s20, %s1022_s20   ;;  %s806_s19 = sphi %s856_s19, %s1021_s19   ;;  %s802_s18 = sphi %s854_s18, %s1020_s18  }
   0x4   : > { %s877_s24 = sadd.s32 1, %s814_s21   ;;  %s135_s25 = sadd.s32 1, %s810_s20 }
   0x5   : > { %s132_s26 = ssub.s32 %s814_s21, %s877_s24  ;;  %p145_p0 = scmp.ne.s32.totalorder %s810_s20, %s806_s19 }
   0x6   : > { %p133_p1 = scmp.eq.s32.totalorder %s132_s26, 0  ;;  %p146_p2 = scmp.eq.s32.totalorder %s643_s22, 2 }
   0x7   : > { %p151_p3 = scmp.ne.s32.totalorder %s806_s19, %s802_s18  ;;  %p152_p4 = scmp.eq.s32.totalorder %s644_s23, 2 }
   0x8   : > { %s887_s27 = scalar_select %p133_p1, %s810_s20, %s135_s25  }
   0x9   : > { %p889_p5 = por %p146_p2, %p145_p0  ;;  %p893_p6 = por %p152_p4, %p151_p3 }
   0xa   : > { %p647_p7 = scmp.ge.s32.totalorder %s814_s21, 1  ;;  %p191_p8 = scmp.lt.s32.totalorder %s814_s21, 4 }
   0xc   : > { %p192_p9 = pnand %p647_p7, %p191_p8 }
   0xd   : > { %s899_s30 = sshll.u32 (!%p192_p9), %s643_s22, 4  ;;  %s216_s11 = sand.u32 (!%p192_p9), 1, %s806_s19  }
   0xe   : > { %195 = sbr.rel (%p192_p9) target bundleno = 1009 (0x3f1), region = 40  ;;  %p219_p10 = scmp.lt.s32.totalorder (!%p192_p9), %s899_s30, 47 }
   0xf   : > { %s217_s12 = scalar_lea.vmem (!%p192_p9), [#allocation2], %s216_s11  ;;  %s587_s16 = scalar_lea.hbm (!%p192_p9), %s1017_s5, %s899_s30 }
  0x10   : > { %s589_s13 = sshll.u32 (!%p192_p9), %s217_s12, 4  ;;  %s577_s17 = scalar_lea.sflag (!%p192_p9), [#allocation3], %s216_s11  ;;  %s590_s13 = int_to_ptr.vmem [resolvable:$true] %s589_s13 }
  0x11   : > { %s754_s22 = scalar_lea.vmem (!%p192_p9), %s590_s13, 16  ;;  %s823_s23 = smov (!%p192_p9), [#allocation2]  }
  0x12   : > { %p755_p11 = scmp.ne.s32.totalorder (!%p192_p9), %s590_s13, %s754_s22  ;;  %s758_s25 = sshll.u32 (!%p192_p9), %s823_s23, 4  ;;  %s759_s25 = int_to_ptr.vmem [resolvable:$false] %s758_s25 }
  0x13   : > { %s220_s6 = scalar_select %p219_p10, %s899_s30, 47  ;;  %v816_v0 = vmov 0.0   ;;  %vm817_vm0 = vmmov 0   ;;  %v818_v3 = vmov 0   ;;  %v920_v4 = vld [vmem:[%s1016_s4] sm:$0xff]  ;;  %v927_v6 = vld [vmem:[%s1016_s4 + $0x8] sm:$0xff] }
  0x14   : > { %673 = vmatprep.subr.bf16.mxu0 %v816_v0  ;;  %679 = vmatprep.subr.bf16.mxu1 %v816_v0  ;;  %vm297_vm1 = vcmask 1043456   ;;  %v750_v23 = vld [vmem:[%s1013_s1] sm:$0xff]   ;;  %vm293_vm2 = vcmask 64512   ;;  %v819_v24 = vmov 1   ;;  %vm364_vm5 = vcmask 130048   ;;  %v752_v53 = vld [vmem:[%s1014_s2 + $0x8] sm:$0xff]   ;;  %p756_p12 = pnand %p755_p11, %p889_p5  ;;  %p761_p0 = scmp.lt.s32.totalorder %s590_s13, %s759_s25 }
  0x15   : > { %s649_s7 = sshll.u32 %s220_s6, 3  ;;  %675 = vmatprep.mubr.msk.bf16.mxu0 %vm817_vm0, %v816_v0  ;;  %681 = vmatprep.mubr.msk.bf16.mxu1 %vm817_vm0, %v816_v0  ;;  %v751_v38 = vld [vmem:[%s1014_s2] sm:$0xff]   ;;  %v820_v39 = vmov 2   ;;  %v821_v54 = vmov 3   ;;  %v822_v55 = vmov 4   ;;  %v550_v57 = vld [vmem:[%s1015_s3 + $0x8] sm:$0xff] }
  0x16   : > { %s906_s10 = scalar_lea.vmem %s1012_s0, %s649_s7  ;;  %743 = vset.pattern.permute.xlu1 %v818_v3  ;;  %v549_v56 = vld [vmem:[%s1015_s3] sm:$0xff]  ;;  %p757_p13 = pneg %p756_p12 }
  0x17   : > { %v227_v1 = vld [vmem:[%s906_s10] sm:$0xff]  ;;  %v228_v2 = vld [vmem:[%s906_s10 + $0x8] sm:$0xff]  ;;  %v229_v5 = vld [vmem:[%s906_s10 + $0x10] sm:$0xff]  ;;  %280 = vperm.xlu1 %743, %v920_v4   ;;  %s760_s26 = scalar_lea.vmem %s759_s25, 32 }
  0x18   : > { %243 = vxpose.xlu0.b32.start [1/16] (narrow) %v227_v1, 8  ;;  %v230_v7 = vld [vmem:[%s906_s10 + $0x18] sm:$0xff]  ;;  %v231_v8 = vld [vmem:[%s906_s10 + $0x20] sm:$0xff]  ;;  %v232_v9 = vld [vmem:[%s906_s10 + $0x28] sm:$0xff]  ;;  %p762_p1 = scmp.lt.s32.totalorder %s760_s26, %s754_s22 }
  0x19   : > { %v233_v10 = vld [vmem:[%s906_s10 + $0x30] sm:$0xff]  ;;  %v234_v11 = vld [vmem:[%s906_s10 + $0x38] sm:$0xff]  ;;  %v235_v12 = vld [vmem:[%s906_s10 + $0x40] sm:$0xff] }
  0x1a   : > { %v236_v13 = vld [vmem:[%s906_s10 + $0x48] sm:$0xff]  ;;  %v237_v14 = vld [vmem:[%s906_s10 + $0x50] sm:$0xff]  ;;  %v238_v15 = vld [vmem:[%s906_s10 + $0x58] sm:$0xff]  ;;  %p763_p2 = por %p762_p1, %p761_p0 }
  0x1b   : > { %285 = vperm.xlu1 %743, %v927_v6   ;;  %v239_v16 = vld [vmem:[%s906_s10 + $0x60] sm:$0xff]  ;;  %v240_v17 = vld [vmem:[%s906_s10 + $0x68] sm:$0xff]  ;;  %v241_v18 = vld [vmem:[%s906_s10 + $0x70] sm:$0xff] }
  0x1c   : > { %244 = vxpose.xlu0.b32.cont [2/16] (narrow) %v228_v2, 8  ;;  %v242_v19 = vld [vmem:[%s906_s10 + $0x78] sm:$0xff]  ;;  %p764_p3 = pnand %p763_p2, %p757_p13 }
  0x1f   : > { %744 = vset.pattern.permute.xlu1 %v819_v24 }
  0x20   : > { %245 = vxpose.xlu0.b32.cont [3/16] (narrow) %v229_v5, 8  ;;  %352 = vperm.xlu1 %744, %v920_v4  }
  0x24   : > { %246 = vxpose.xlu0.b32.cont [4/16] (narrow) %v230_v7, 8  ;;  %356 = vperm.xlu1 %744, %v927_v6  }
  0x28   : > { %247 = vxpose.xlu0.b32.cont [5/16] (narrow) %v231_v8, 8  ;;  %745 = vset.pattern.permute.xlu1 %v820_v39  ;;  %v753_v8 = vld [vmem:[%s1014_s2 + $0x10] sm:$0xff]  }
  0x29   : > { %420 = vperm.xlu1 %745, %v920_v4  }
  0x2c   : > { %248 = vxpose.xlu0.b32.cont [6/16] (narrow) %v232_v9, 8 }
  0x2d   : > { %424 = vperm.xlu1 %745, %v927_v6  }
  0x30   : > { %249 = vxpose.xlu0.b32.cont [7/16] (narrow) %v233_v10, 8 }
  0x31   : > { %746 = vset.pattern.permute.xlu1 %v821_v54 }
  0x32   : > { %487 = vperm.xlu1 %746, %v920_v4  }
  0x34   : > { %250 = vxpose.xlu0.b32.cont [8/16] (narrow) %v234_v11, 8 }
  0x36   : > { %491 = vperm.xlu1 %746, %v927_v6  }
  0x38   : > { %251 = vxpose.xlu0.b32.cont [9/16] (narrow) %v235_v12, 8 }
  0x3a   : > { %747 = vset.pattern.permute.xlu1 %v818_v3 }
  0x3b   : > { %553 = vperm.xlu1 %747, %v549_v56  }
  0x3c   : > { %252 = vxpose.xlu0.b32.cont [10/16] (narrow) %v236_v13, 8 }
  0x3f   : > { %558 = vperm.xlu1 %747, %v550_v57  }
  0x40   : > { %253 = vxpose.xlu0.b32.cont [11/16] (narrow) %v237_v14, 8 }
  0x43   : > { %748 = vset.pattern.permute.xlu1 %v822_v55 }
  0x44   : > { %254 = vxpose.xlu0.b32.cont [12/16] (narrow) %v238_v15, 8  ;;  %571 = vperm.xlu1 %748, %v920_v4  }
  0x48   : > { %255 = vxpose.xlu0.b32.cont [13/16] (narrow) %v239_v16, 8 }
  0x4c   : > { %256 = vxpose.xlu0.b32.cont [14/16] (narrow) %v240_v17, 8 }
  0x50   : > { %257 = vxpose.xlu0.b32.cont [15/16] (narrow) %v241_v18, 8 }
  0x54   : > { %258 = vxpose.xlu0.b32.end [16/16] (narrow) %v242_v19, 8 }
  0x7d   : > { %749 = vset.pattern.permute.xlu0 %v822_v55 }
  0x92   : > { %v281_v25 = vpop.permute.xlu1 %280 }
  0x94   : > { %v259_v20 = vpop.trf.xlu0 }
  0x95   : > { %v275_v21 = vpack.c.bf16 %v259_v20, %v259_v20 }
  0x96   : > { %v286_v29 = vpop.permute.xlu1 %285 }
  0x97   : > { %v299_v22 = vsel %vm297_vm1, %v275_v21, 0 }
  0x98   : > { %674 = vmatpush3.bf16.msra.mxu0 %v299_v22 }
  0x99   : > { %685 = vmatprep.subr.bf16.mxu0 %v816_v0 }
  0x9b   : > { %676 = vmatmul.mubr.msk.bf16.vlgmr.msra.gmra.mxu0 %vm293_vm2, %v750_v23  ;;  %v353_v40 = vpop.permute.xlu1 %352 }
  0x9c   : > { %687 = vmatprep.mubr.msk.bf16.mxu0 %vm817_vm0, %v816_v0 }
  0x9f   : > { %v357_v44 = vpop.permute.xlu1 %356 }
  0xa4   : > { %v421_v58 = vpop.permute.xlu1 %420 }
  0xa8   : > { %v425_v62 = vpop.permute.xlu1 %424 }
  0xad   : > { %v488_v4 = vpop.permute.xlu1 %487 }
  0xb1   : > { %v492_v9 = vpop.permute.xlu1 %491 }
  0xb6   : > { %v554_v14 = vpop.permute.xlu1 %553 }
  0xba   : > { %v559_v20 = vpop.permute.xlu1 %558 }
 0x15b   : > { %v335_v26 = vpop.f32.mrf.mxu0 }
 0x15c   : > { %v336_v27 = vadd.f32 %v335_v26, %v281_v25 }
 0x15d   : > { %v677_v28 = vpop.f32.mrf.mxu0 }
 0x15e   : > { %v344_v31 = vmul.f32 0.01, %v336_v27  ;;  %vm342_vm3 = vcmp.gt.f32.partialorder %v336_v27, 0.0 }
 0x15f   : > { %v338_v30 = vpop.f32.mrf.mxu0 }
 0x160   : > { %v339_v32 = vadd.f32 %v338_v30, %v286_v29  ;;  %v346_v35 = vsel %vm342_vm3, %v336_v27, %v344_v31  ;;  %v572_v30 = vpop.permute.xlu1 %571 }
 0x161   : > { %v678_v33 = vpop.f32.mrf.mxu0 }
 0x162   : > { %v345_v34 = vmul.f32 0.01, %v339_v32  ;;  %vm343_vm4 = vcmp.gt.f32.partialorder %v339_v32, 0.0 }
 0x164   : > { %v347_v36 = vsel %vm343_vm4, %v339_v32, %v345_v34 }
 0x165   : > { %v350_v37 = vpack.c.bf16 %v347_v36, %v346_v35 }
 0x167   : > { %680 = vmatpush3.bf16.msra.mxu1 %v350_v37 }
 0x168   : > { %691 = vmatprep.subr.bf16.mxu1 %v816_v0 }
 0x16a   : > { %682 = vmatmul.mubr.msk.bf16.vlgmr.msra.gmra.mxu1 %vm364_vm5, %v751_v38 }
 0x16b   : > { %693 = vmatprep.mubr.msk.bf16.mxu1 %vm817_vm0, %v816_v0 }
 0x22a   : > { %v402_v41 = vpop.f32.mrf.mxu1 }
 0x22b   : > { %v403_v42 = vadd.f32 %v402_v41, %v353_v40 }
 0x22c   : > { %v683_v43 = vpop.f32.mrf.mxu1 }
 0x22d   : > { %v411_v46 = vmul.f32 0.01, %v403_v42  ;;  %vm409_vm6 = vcmp.gt.f32.partialorder %v403_v42, 0.0 }
 0x22e   : > { %v405_v45 = vpop.f32.mrf.mxu1 }
 0x22f   : > { %v406_v47 = vadd.f32 %v405_v45, %v357_v44  ;;  %v413_v50 = vsel %vm409_vm6, %v403_v42, %v411_v46 }
 0x230   : > { %v684_v48 = vpop.f32.mrf.mxu1 }
 0x231   : > { %vm410_vm7 = vcmp.gt.f32.partialorder %v406_v47, 0.0  ;;  %v412_v49 = vmul.f32 0.01, %v406_v47 }
 0x233   : > { %v414_v51 = vsel %vm410_vm7, %v406_v47, %v412_v49 }
 0x234   : > { %v418_v52 = vpack.c.bf16 %v414_v51, %v413_v50 }
 0x236   : > { %686 = vmatpush3.bf16.msra.mxu0 %v418_v52 }
 0x239   : > { %688 = vmatmul.mubr.msk.bf16.vlgmr.msra.gmra.mxu0 %vm364_vm5, %v752_v53 }
 0x2f9   : > { %v469_v59 = vpop.f32.mrf.mxu0 }
 0x2fa   : > { %v470_v60 = vadd.f32 %v469_v59, %v421_v58 }
 0x2fb   : > { %v689_v61 = vpop.f32.mrf.mxu0 }
 0x2fc   : > { %v478_v0 = vmul.f32 0.01, %v470_v60  ;;  %vm476_vm8 = vcmp.gt.f32.partialorder %v470_v60, 0.0 }
 0x2fd   : > { %v472_v63 = vpop.f32.mrf.mxu0 }
 0x2fe   : > { %v473_v1 = vadd.f32 %v472_v63, %v425_v62  ;;  %v480_v5 = vsel %vm476_vm8, %v470_v60, %v478_v0 }
 0x2ff   : > { %v690_v2 = vpop.f32.mrf.mxu0 }
 0x300   : > { %vm477_vm9 = vcmp.gt.f32.partialorder %v473_v1, 0.0  ;;  %v479_v3 = vmul.f32 0.01, %v473_v1 }
 0x302   : > { %v481_v6 = vsel %vm477_vm9, %v473_v1, %v479_v3 }
 0x303   : > { %v485_v7 = vpack.c.bf16 %v481_v6, %v480_v5 }
 0x305   : > { %692 = vmatpush3.bf16.msra.mxu1 %v485_v7 }
 0x308   : > { %694 = vmatmul.mubr.msk.bf16.vlgmr.msra.gmra.mxu1 %vm364_vm5, %v753_v8 }
 0x3c8   : > { %v536_v10 = vpop.f32.mrf.mxu1 }
 0x3c9   : > { %v537_v11 = vadd.f32 %v536_v10, %v488_v4 }
 0x3ca   : > { %v695_v12 = vpop.f32.mrf.mxu1 }
 0x3cb   : > { %v545_v13 = vmul.f32 0.01, %v537_v11  ;;  %vm543_vm10 = vcmp.gt.f32.partialorder %v537_v11, 0.0 }
 0x3cc   : > { %v539_v15 = vpop.f32.mrf.mxu1 }
 0x3cd   : > { %v540_v16 = vadd.f32 %v539_v15, %v492_v9  ;;  %v547_v19 = vsel %vm543_vm10, %v537_v11, %v545_v13 }
 0x3ce   : > { %v696_v17 = vpop.f32.mrf.mxu1  ;;  %v561_v22 = vmul.f32 %v554_v14, %v547_v19 }
 0x3cf   : > { %v546_v18 = vmul.f32 0.01, %v540_v16  ;;  %vm544_vm11 = vcmp.gt.f32.partialorder %v540_v16, 0.0 }
 0x3d1   : > { %v548_v21 = vsel %vm544_vm11, %v540_v16, %v546_v18 }
 0x3d2   : > { %v562_v23 = vmul.f32 %v559_v20, %v548_v21 }
 0x3d4   : > { %v563_v24 = vadd.f32 %v562_v23, %v561_v22 }
 0x3d6   : > { %v564_v25 = vrot.slane %v563_v24, 4 }
 0x3d8   : > { %v565_v26 = vadd.f32 %v564_v25, %v563_v24 }
 0x3da   : > { %v566_v27 = vrot.slane %v565_v26, 2 }
 0x3dc   : > { %v567_v28 = vadd.f32 %v566_v27, %v565_v26 }
 0x3de   : > { %v568_v29 = vrot.slane %v567_v28, 1 }
 0x3e0   : > { %v569_v31 = vadd.f32 %v568_v29, %v567_v28 }
 0x3e2   : > { %v574_v32 = vadd.f32 %v572_v30, %v569_v31 }
 0x3e4   : > { %575 = vst [vmem:[%s217_s12] sm:$0x1] %v574_v32 }
 0x3e5   : > { %767 = shalt.err (!%p764_p3)
}
 0x3e6   : > { %s768_s6 = scalar_lea.hbm %s587_s16, 16  ;;  %s772_s8 = scalar_lea.hbm %s1017_s5, 48 }
 0x3e7   : > { %p769_p4 = scmp.ne.s32.totalorder %s587_s16, %s768_s6  ;;  %p773_p9 = scmp.lt.s32.totalorder %s587_s16, %s1017_s5 }
 0x3e8   : > { %p774_p10 = scmp.lt.s32.totalorder %s772_s8, %s768_s6 }
 0x3e9   : > { %p770_p7 = pnand %p769_p4, %p889_p5 }
 0x3ea   : > { %p775_p11 = por %p774_p10, %p773_p9 }
 0x3eb   : > { %p771_p8 = pneg %p770_p7 }
 0x3ed   : > { %p776_p12 = pnand %p775_p11, %p771_p8 }
 0x3ef   : > { %779 = shalt.err (!%p776_p12)
}
 0x3f0   : > { %697 = dma.vmem_to_hbm [thread:$0]  (%p889_p5), %s590_s13, 16, %s587_s16, %s577_s17  }
 0x3f1 PF: > { %p703_p13 = scmp.ge.s32.totalorder %s814_s21, 2  ;;  %s601_s11 = sand.u32 1, %s802_s18  }
 0x3f2   : > { %s602_s12 = scalar_lea.sflag [#allocation3], %s601_s11 }
 0x3f3   : > { %p700_p0 = pnand %p703_p13, %p893_p6 }
 0x3f5   : > { %p701_p1 = pneg %p700_p0 }
 0x3f7   : > { %797 = dma.done.wait (%p701_p1), %s602_s12, 16  }
 0x3f8   : > { %799 = vsyncadd (%p701_p1), %s602_s12, 4294967280  ;;  %p15_p2 = scmp.ge.s32.totalorder %s877_s24, 5   ;;  %s1020_s18 = smov %s806_s19 }
 0x3f9   : > { %s1021_s19 = smov %s810_s20  ;;  %s1022_s20 = smov %s887_s27 }
 0x3fa   : > { %s1023_s21 = smov %s877_s24  ;;  %17 = sbr.rel (!%p15_p2) target bundleno = 3 (0x3), region = 77 }
 0x3ff   :  { %606 = vsyncpa [#allocation3], 1 }
 0x400   :  { %608 = vsyncpa [#allocation3 + $0x1], 1 }

</bundles_post_ra>
